<compile_context>
chip_gen: v5e
topology: v5e:2x2
jax: 0.10.0
libtpu: 0.0.40
codegen_flags: <defaults>
</compile_context>

<pallas_src>
import functools

import jax
import jax.numpy as jnp
from jax.experimental import pallas as pl
from jax.experimental.pallas import tpu as pltpu


def _round_up(x, m):
    return m * ((x + m - 1) // m)


# ---------------------------------------------------------------------------
# Kernel
# ---------------------------------------------------------------------------
def _ffn_kernel(x_ref, w13_ref, b13_ref, w2_ref, b2_ref, o_ref, *scratch):
    """Fused SwiGLU FFN tile.

    Grid = (M_pad // tm, H // th); the hidden axis (axis 1) is the reduction
    axis.  Each step computes both the gate and up projections with a single
    MXU matmul against the fused (D_in, 2*th) weight tile, applies
    silu(gate) * up, and accumulates its contribution through W2 into a
    resident f32 accumulator (a scratch buffer, or o_ref itself when the
    output dtype is already f32).
    """
    acc_ref = scratch[0] if scratch else o_ref
    h = pl.program_id(1)

    @pl.when(h == 0)
    def _():
        acc_ref[...] = jnp.zeros_like(acc_ref)

    th = w13_ref.shape[1] // 2
    x = x_ref[...].astype(w13_ref.dtype)       # cast to the MXU dtype in-kernel
    # [gate | up] = x @ [W1_tile | W3_tile] + [b1_tile | b3_tile]  (one matmul)
    gu = jnp.dot(x, w13_ref[...], preferred_element_type=jnp.float32) + b13_ref[...]
    gate = gu[:, :th]
    up = gu[:, th:]
    # Silu(w1_o, w3_o) == silu(w1_o) * w3_o, computed in f32.
    act = gate * jax.nn.sigmoid(gate) * up
    # Accumulate the partial contraction over the hidden dim through W2.
    acc_ref[...] += jnp.dot(act.astype(w2_ref.dtype), w2_ref[...],
                            preferred_element_type=jnp.float32)

    @pl.when(h == pl.num_programs(1) - 1)
    def _():
        o_ref[...] = (acc_ref[...] + b2_ref[...]).astype(o_ref.dtype)


# ---------------------------------------------------------------------------
# Per-generation tiling selection
# ---------------------------------------------------------------------------
def select_ffn_config(hidden_features):
    """Pick (tm, th, vmem_budget_bytes, multi_core) for the current TPU."""
    try:
        vmem_cap = int(pltpu.get_tpu_info().vmem_capacity_bytes)
    except Exception:
        vmem_cap = 64 * 1024 * 1024          # conservative: small-VMEM class
    if vmem_cap >= 96 * 1024 * 1024:         # v5e / v6e class (128 MiB, 1 TC)
        tm, th = 512, 512                    # v5e users may prefer tm=256..384
        budget = 100 * 1024 * 1024
        multi_core = False
    else:                                    # v7x class (64 MiB per TC, 2 TCs)
        tm, th = 384, 256
        budget = 52 * 1024 * 1024
        multi_core = True
    while hidden_features % th != 0 and th > 128:
        th //= 2
    th = min(th, hidden_features)
    return tm, th, budget, multi_core


# ---------------------------------------------------------------------------
# One-time weight fusion / cast (do this at parameter-load time, NOT per call)
# ---------------------------------------------------------------------------
def prepare_ffn_params(w1, b1, w3, b3, w2, b2, *, th, compute_dtype=jnp.bfloat16):
    """Fuse the gate/up projections and pre-cast the weights to the MXU dtype.

    Per hidden tile h, columns [h*2*th, h*2*th + th) of `w13` hold the W1 tile
    and the following th columns hold the W3 tile, so one BlockSpec tile feeds
    one MXU matmul in the kernel.  Call this OUTSIDE the jitted forward so the
    extra pass over the weights happens once, not per forward call.
    """
    D_in, H = w1.shape
    D_out = w2.shape[1]
    assert H % th == 0, "hidden dim must be divisible by the hidden tile"
    nh = H // th
    w13 = jnp.concatenate(
        [w1.reshape(D_in, nh, th), w3.reshape(D_in, nh, th)], axis=2
    ).reshape(D_in, 2 * H).astype(compute_dtype)
    b13 = jnp.concatenate(
        [b1.reshape(nh, th), b3.reshape(nh, th)], axis=1
    ).reshape(1, 2 * H).astype(jnp.float32)
    w2c = w2.astype(compute_dtype)
    b2_2d = b2.reshape(1, D_out).astype(jnp.float32)
    return w13, b13, w2c, b2_2d


# ---------------------------------------------------------------------------
# Forward (jitted; weights already fused / cast)
# ---------------------------------------------------------------------------
@functools.partial(jax.jit,
                   static_argnames=("th", "tm", "vmem_budget", "multi_core"))
def base_feedforward_fused(x, w13, b13, w2c, b2_2d, *, th, tm=512,
                           vmem_budget=100 * 1024 * 1024, multi_core=False):
    """x: (B, S, D_in) -> (B, S, D_out), with pre-fused / pre-cast weights."""
    B, S, D_in = x.shape
    H = w13.shape[1] // 2
    D_out = w2c.shape[1]
    M = B * S
    assert H % th == 0
    nh = H // th

    out_dtype = x.dtype
    # Accumulate straight into the resident output block when it is f32.
    use_scratch = jnp.dtype(out_dtype) != jnp.dtype(jnp.float32)

    # Clamp tm for tiny M while keeping the sublane (8) constraint.
    tm_eff = min(tm, _round_up(M, 8))
    # On the 2-TensorCore generation the m axis is what gets sharded across
    # cores: keep at least 2 m tiles whenever there is enough work to split.
    if multi_core and M > 256 and pl.cdiv(M, tm_eff) < 2:
        tm_eff = _round_up(pl.cdiv(M, 2), 8)
    M_pad = tm_eff * pl.cdiv(M, tm_eff)

    x2d = x.reshape(M, D_in)
    if M_pad != M:
        x2d = jnp.pad(x2d, ((0, M_pad - M), (0, 0)))

    def itemsize(dt):
        return jnp.dtype(dt).itemsize

    # Double-buffered pipeline footprint -> explicit vmem limit with headroom,
    # clamped to a per-generation budget (never the full 64 MiB of a v7x TC).
    need = (2 * tm_eff * D_in * itemsize(x2d.dtype)
            + 2 * D_in * 2 * th * itemsize(w13.dtype)
            + 2 * 8 * 2 * th * 4
            + 2 * th * D_out * itemsize(w2c.dtype)
            + 2 * 8 * D_out * 4
            + 2 * tm_eff * D_out * itemsize(out_dtype)
            + (tm_eff * D_out * 4 if use_scratch else 0))
    vmem_limit = int(min(vmem_budget,
                         max(int(need * 1.25) + (2 << 20), 16 << 20)))

    flops = 2 * M_pad * D_in * (2 * H) + 2 * M_pad * H * D_out
    bytes_accessed = int(
        M_pad * D_in * itemsize(x2d.dtype)
        + (M_pad // tm_eff) * (w13.size * itemsize(w13.dtype)
                               + w2c.size * itemsize(w2c.dtype))
        + M_pad * D_out * itemsize(out_dtype))

    scratch_shapes = ([pltpu.VMEM((tm_eff, D_out), jnp.float32)]
                      if use_scratch else [])

    out2d = pl.pallas_call(
        _ffn_kernel,
        out_shape=jax.ShapeDtypeStruct((M_pad, D_out), out_dtype),
        grid_spec=pltpu.PrefetchScalarGridSpec(
            num_scalar_prefetch=0,
            grid=(M_pad // tm_eff, nh),
            in_specs=[
                pl.BlockSpec((tm_eff, D_in), lambda m, h: (m, 0)),   # x (resident over h)
                pl.BlockSpec((D_in, 2 * th), lambda m, h: (0, h)),   # fused W1|W3
                pl.BlockSpec((1, 2 * th), lambda m, h: (0, h)),      # fused b1|b3
                pl.BlockSpec((th, D_out), lambda m, h: (h, 0)),      # W2
                pl.BlockSpec((1, D_out), lambda m, h: (0, 0)),       # b2
            ],
            out_specs=pl.BlockSpec((tm_eff, D_out), lambda m, h: (m, 0)),
            scratch_shapes=scratch_shapes,
        ),
        compiler_params=pltpu.CompilerParams(
            dimension_semantics=("parallel", "arbitrary"),
            vmem_limit_bytes=vmem_limit,
        ),
        cost_estimate=pl.CostEstimate(
            flops=flops,
            transcendentals=M_pad * H,
            bytes_accessed=bytes_accessed,
        ),
    )(x2d, w13, b13, w2c, b2_2d)

    return out2d[:M].reshape(B, S, D_out)


def base_feedforward(x, w1, b1, w3, b3, w2, b2):
    """Convenience entry point.  For repeated forward calls, hoist
    select_ffn_config + prepare_ffn_params out of the loop (done once in
    __main__ below)."""
    tm, th, budget, multi_core = select_ffn_config(w1.shape[1])
    fused = prepare_ffn_params(w1, b1, w3, b3, w2, b2, th=th)
    return base_feedforward_fused(x, *fused, th=th, tm=tm,
                                  vmem_budget=budget, multi_core=multi_core)


# ---------------------------------------------------------------------------
# Pure-JAX reference
# ---------------------------------------------------------------------------
def _reference(x, w1, b1, w3, b3, w2, b2, compute_dtype=jnp.float32):
    """Reference forward, optionally matching the kernel's bf16 matmul casts."""
    B, S, D_in = x.shape
    D_out = w2.shape[1]
    xc = x.reshape(-1, D_in).astype(compute_dtype)
    g = jnp.dot(xc, w1.astype(compute_dtype),
                preferred_element_type=jnp.float32) + b1.astype(jnp.float32)
    u = jnp.dot(xc, w3.astype(compute_dtype),
                preferred_element_type=jnp.float32) + b3.astype(jnp.float32)
    a = (g * jax.nn.sigmoid(g) * u).astype(compute_dtype)
    o = jnp.dot(a, w2.astype(compute_dtype),
                preferred_element_type=jnp.float32) + b2.astype(jnp.float32)
    return o.astype(x.dtype).reshape(B, S, D_out)


if __name__ == "__main__":
    # Module config (small, consistent with the forward semantics).
    batch, seq = 2, 8
    in_features = 32
    hidden_features = 200          # rounded up by multiple_of, as in __init__
    out_features = 32
    multiple_of = 256
    hidden = multiple_of * ((hidden_features + multiple_of - 1) // multiple_of)  # -> 256

    key = jax.random.PRNGKey(0)
    kx, k1, kb1, k3, kb3, k2, kb2 = jax.random.split(key, 7)

    dtype = jnp.float32
    x = jax.random.normal(kx, (batch, seq, in_features), dtype)
    # Deterministic synthetic parameters (linear layers: y = x @ W + b).
    w1 = jax.random.normal(k1, (in_features, hidden), dtype) * 0.05
    b1 = jax.random.normal(kb1, (hidden,), dtype) * 0.01
    w3 = jax.random.normal(k3, (in_features, hidden), dtype) * 0.05
    b3 = jax.random.normal(kb3, (hidden,), dtype) * 0.01
    w2 = jax.random.normal(k2, (hidden, out_features), dtype) * 0.05
    b2 = jax.random.normal(kb2, (out_features,), dtype) * 0.01

    # One-time (parameter-load time) config + weight fusion/cast, then forward.
    tm, th, budget, multi_core = select_ffn_config(hidden)
    w13, b13, w2c, b2_2d = prepare_ffn_params(w1, b1, w3, b3, w2, b2, th=th)
    out = base_feedforward_fused(x, w13, b13, w2c, b2_2d, th=th, tm=tm,
                                 vmem_budget=budget, multi_core=multi_core)
    out = jax.block_until_ready(out)
    assert out.shape == (batch, seq, out_features)

    # Check against a reference using the same bf16 matmul casts (tight) ...
    ref_matched = _reference(x, w1, b1, w3, b3, w2, b2, compute_dtype=jnp.bfloat16)
    assert jnp.allclose(out, ref_matched, atol=2e-3, rtol=2e-3), "mismatch vs bf16 reference"
    # ... and against the full-f32 reference (loose, bf16 rounding expected).
    ref_f32 = _reference(x, w1, b1, w3, b3, w2, b2, compute_dtype=jnp.float32)
    assert jnp.allclose(out, ref_f32, atol=3e-2, rtol=3e-2), "mismatch vs f32 reference"

    # TODO(synk): tensor/sequence parallelism (process_group, column_cls/row_cls)
    # is not modeled; this is the single-device dense forward.
    print("KERNEL_OK")
</pallas_src>

<mosaic_0001>
module attributes {stable_mosaic.version = 11 : i64} {
  func.func @_ffn_kernel(%arg0: i32, %arg1: i32, %arg2: memref<16x32xf32, #tpu.memory_space<vmem>>, %arg3: memref<32x512xbf16, #tpu.memory_space<vmem>>, %arg4: memref<1x512xf32, #tpu.memory_space<vmem>>, %arg5: memref<256x32xbf16, #tpu.memory_space<vmem>>, %arg6: memref<1x32xf32, #tpu.memory_space<vmem>>, %arg7: memref<16x32xf32, #tpu.memory_space<vmem>>) attributes {dimension_semantics = [#tpu.dimension_semantics<parallel>, #tpu.dimension_semantics<arbitrary>], iteration_bounds = array<i64: 1, 1>, scalar_prefetch = 0 : i64, scratch_operands = 0 : i64, tpu.core_type = #tpu.core_type<tc>, window_params = [{transform_indices = @transform_0, window_bounds = array<i64: 16, 32>}, {transform_indices = @transform_1, window_bounds = array<i64: 32, 512>}, {transform_indices = @transform_2, window_bounds = array<i64: 1, 512>}, {transform_indices = @transform_3, window_bounds = array<i64: 256, 32>}, {pipeline_mode = #tpu.pipeline_mode<synchronous>, transform_indices = @transform_4, window_bounds = array<i64: 1, 32>}, {transform_indices = @transform_5, window_bounds = array<i64: 16, 32>}]} {
    %c0_i32 = arith.constant 0 : i32
    %0 = arith.cmpi eq, %arg1, %c0_i32 : i32
    %1 = arith.extui %0 : i1 to i32
    %c0_i32_0 = arith.constant 0 : i32
    %2 = arith.cmpi ne, %1, %c0_i32_0 : i32
    scf.if %2 {
      %cst_16 = arith.constant 0.000000e+00 : f32
      %28 = vector.broadcast %cst_16 : f32 to vector<16x32xf32>
      %c0_17 = arith.constant 0 : index
      %c0_18 = arith.constant 0 : index
      %29 = vector.load %arg7[%c0_17, %c0_18] : memref<16x32xf32, #tpu.memory_space<vmem>>, vector<16x32xf32>
      tpu.vector_store %arg7[%c0_17, %c0_18], %28 {strides = array<i32>} : memref<16x32xf32, #tpu.memory_space<vmem>>, vector<16x32xf32>,
    } else {
    }
    %c0 = arith.constant 0 : index
    %c0_1 = arith.constant 0 : index
    %3 = vector.load %arg2[%c0, %c0_1] : memref<16x32xf32, #tpu.memory_space<vmem>>, vector<16x32xf32>
    %4 = arith.truncf %3 : vector<16x32xf32> to vector<16x32xbf16>
    %c0_2 = arith.constant 0 : index
    %c0_3 = arith.constant 0 : index
    %5 = vector.load %arg3[%c0_2, %c0_3] : memref<32x512xbf16, #tpu.memory_space<vmem>>, vector<32x512xbf16>
    %cst = arith.constant dense<0.000000e+00> : vector<16x512xf32>
    %6 = tpu.matmul %4, %5, %cst {dimension_numbers = #tpu.dot_dimension_numbers<[1], [0], [0], [1], [0, 0, 1, 1], [], []>} : vector<16x32xbf16>, vector<32x512xbf16>, vector<16x512xf32> -> vector<16x512xf32>
    %c0_4 = arith.constant 0 : index
    %c0_5 = arith.constant 0 : index
    %7 = vector.load %arg4[%c0_4, %c0_5] : memref<1x512xf32, #tpu.memory_space<vmem>>, vector<1x512xf32>
    %8 = vector.broadcast %7 : vector<1x512xf32> to vector<16x512xf32>
    %9 = arith.addf %6, %8 : vector<16x512xf32>
    %10 = vector.extract_strided_slice %9 {offsets = [0, 0], sizes = [16, 256], strides = [1, 1]} : vector<16x512xf32> to vector<16x256xf32>
    %11 = vector.extract_strided_slice %9 {offsets = [0, 256], sizes = [16, 256], strides = [1, 1]} : vector<16x512xf32> to vector<16x256xf32>
    %12 = arith.negf %10 : vector<16x256xf32>
    %13 = math.exp %12 : vector<16x256xf32>
    %cst_6 = arith.constant 1.000000e+00 : f32
    %14 = vector.broadcast %cst_6 : f32 to vector<16x256xf32>
    %15 = arith.addf %14, %13 : vector<16x256xf32>
    %16 = arith.divf %14, %15 : vector<16x256xf32>
    %17 = arith.mulf %10, %16 : vector<16x256xf32>
    %18 = arith.mulf %17, %11 : vector<16x256xf32>
    %c0_7 = arith.constant 0 : index
    %c0_8 = arith.constant 0 : index
    %19 = vector.load %arg7[%c0_7, %c0_8] : memref<16x32xf32, #tpu.memory_space<vmem>>, vector<16x32xf32>
    %20 = arith.truncf %18 : vector<16x256xf32> to vector<16x256xbf16>
    %c0_9 = arith.constant 0 : index
    %c0_10 = arith.constant 0 : index
    %21 = vector.load %arg5[%c0_9, %c0_10] : memref<256x32xbf16, #tpu.memory_space<vmem>>, vector<256x32xbf16>
    %cst_11 = arith.constant dense<0.000000e+00> : vector<16x32xf32>
    %22 = tpu.matmul %20, %21, %cst_11 {dimension_numbers = #tpu.dot_dimension_numbers<[1], [0], [0], [1], [0, 0, 1, 1], [], []>} : vector<16x256xbf16>, vector<256x32xbf16>, vector<16x32xf32> -> vector<16x32xf32>
    %23 = arith.addf %19, %22 : vector<16x32xf32>
    %c0_12 = arith.constant 0 : index
    %c0_13 = arith.constant 0 : index
    %24 = vector.load %arg7[%c0_12, %c0_13] : memref<16x32xf32, #tpu.memory_space<vmem>>, vector<16x32xf32>
    tpu.vector_store %arg7[%c0_12, %c0_13], %23 {strides = array<i32>} : memref<16x32xf32, #tpu.memory_space<vmem>>, vector<16x32xf32>,
    %c0_i32_14 = arith.constant 0 : i32
    %25 = arith.cmpi eq, %arg1, %c0_i32_14 : i32
    %26 = arith.extui %25 : i1 to i32
    %c0_i32_15 = arith.constant 0 : i32
    %27 = arith.cmpi ne, %26, %c0_i32_15 : i32
    scf.if %27 {
      %c0_16 = arith.constant 0 : index
      %c0_17 = arith.constant 0 : index
      %28 = vector.load %arg7[%c0_16, %c0_17] : memref<16x32xf32, #tpu.memory_space<vmem>>, vector<16x32xf32>
      %c0_18 = arith.constant 0 : index
      %c0_19 = arith.constant 0 : index
      %29 = vector.load %arg6[%c0_18, %c0_19] : memref<1x32xf32, #tpu.memory_space<vmem>>, vector<1x32xf32>
      %30 = vector.broadcast %29 : vector<1x32xf32> to vector<16x32xf32>
      %31 = arith.addf %28, %30 : vector<16x32xf32>
      %c0_20 = arith.constant 0 : index
      %c0_21 = arith.constant 0 : index
      %32 = vector.load %arg7[%c0_20, %c0_21] : memref<16x32xf32, #tpu.memory_space<vmem>>, vector<16x32xf32>
      tpu.vector_store %arg7[%c0_20, %c0_21], %31 {strides = array<i32>} : memref<16x32xf32, #tpu.memory_space<vmem>>, vector<16x32xf32>,
    } else {
    }
    return
  }
  func.func @transform_0(%arg0: i32, %arg1: i32) -> (i32, i32) {
    %c0_i32 = arith.constant 0 : i32
    %c0_i32_0 = arith.constant 0 : i32
    return %arg0, %c0_i32 : i32, i32
  }
  func.func @transform_1(%arg0: i32, %arg1: i32) -> (i32, i32) {
    %c0_i32 = arith.constant 0 : i32
    %c0_i32_0 = arith.constant 0 : i32
    return %c0_i32, %arg1 : i32, i32
  }
  func.func @transform_2(%arg0: i32, %arg1: i32) -> (i32, i32) {
    %c0_i32 = arith.constant 0 : i32
    %c0_i32_0 = arith.constant 0 : i32
    return %c0_i32, %arg1 : i32, i32
  }
  func.func @transform_3(%arg0: i32, %arg1: i32) -> (i32, i32) {
    %c0_i32 = arith.constant 0 : i32
    %c0_i32_0 = arith.constant 0 : i32
    return %arg1, %c0_i32 : i32, i32
  }
  func.func @transform_4(%arg0: i32, %arg1: i32) -> (i32, i32) {
    %c0_i32 = arith.constant 0 : i32
    %c0_i32_0 = arith.constant 0 : i32
    %c0_i32_1 = arith.constant 0 : i32
    return %c0_i32, %c0_i32_0 : i32, i32
  }
  func.func @transform_5(%arg0: i32, %arg1: i32) -> (i32, i32) {
    %c0_i32 = arith.constant 0 : i32
    %c0_i32_0 = arith.constant 0 : i32
    return %arg0, %c0_i32 : i32, i32
  }
}

</mosaic_0001>

<bundles_post_ra>
// kernel: base_feedforward_fused.1
= control target key start
LH: loop header
LB: loop body
LE: loop exit
PB: predicated region body
PF: predicated region fallthrough
CT: control target
= control target key end

     0   :  { %s806_s0 = inlined_call_operand.vmem [shape: f32[16,32], index: 0, kind: input, shape index: {}]   ;;  %s807_s1 = inlined_call_operand.vmem [shape: bf16[32,512], index: 1, kind: input, shape index: {}]   ;;  %s808_s2 = inlined_call_operand.vmem [shape: f32[1,512], index: 2, kind: input, shape index: {}]   ;;  %s809_s3 = inlined_call_operand.vmem [shape: bf16[256,32], index: 3, kind: input, shape index: {}]   ;;  %s810_s4 = inlined_call_operand.vmem [shape: f32[1,32], index: 4, kind: input, shape index: {}]   ;;  %s811_s5 = inlined_call_operand.hbm [shape: f32[16,32], index: 5, kind: output, shape index: {}]  }
   0x1   :  { %v447_v0 = vld [vmem:[%s807_s1 + $0x20] sm:$0xf]  ;;  %v539_v1 = vld [vmem:[%s807_s1 + $0x2c] sm:$0xf0]  ;;  %v537_v2 = vld [vmem:[%s807_s1 + $0x24] sm:$0xf] }
   0x2   :  { %v448_v3 = vor.u32 %v539_v1, %v447_v0  ;;  %v449_v4 = vld [vmem:[%s807_s1 + $0x30] sm:$0xf0]  ;;  %v431_v5 = vld [vmem:[%s807_s1] sm:$0xf]  ;;  %v535_v6 = vld [vmem:[%s807_s1 + $0xc] sm:$0xf0] }
   0x3   :  { %v452_v7 = vor.u32 %v537_v2, %v449_v4  ;;  %v533_v8 = vld [vmem:[%s807_s1 + $0x4] sm:$0xf]  ;;  %v433_v9 = vld [vmem:[%s807_s1 + $0x10] sm:$0xf0]  ;;  %v432_v11 = vor.u32 %v535_v6, %v431_v5  ;;  %v30_v12 = vld [vmem:[%s806_s0 + $0x8] sm:$0xff] }
   0x4   :  { %v29_v10 = vld [vmem:[%s806_s0] sm:$0xff]  ;;  %100 = vmatpush.bf16.msra.mxu2 %v448_v3  ;;  %v455_v13 = vld [vmem:[%s807_s1 + $0x28] sm:$0xf]  ;;  %v540_v14 = vld [vmem:[%s807_s1 + $0x34] sm:$0xf0]  ;;  %v436_v15 = vor.u32 %v533_v8, %v433_v9 }
   0x5   :  { %114 = vmatpush.bf16.msra.mxu3 %v452_v7  ;;  %v456_v16 = vor.u32 %v540_v14, %v455_v13  ;;  %v538_v17 = vld [vmem:[%s807_s1 + $0x2c] sm:$0xf]  ;;  %v457_v18 = vld [vmem:[%s807_s1 + $0x38] sm:$0xf0]  ;;  %v439_v20 = vld [vmem:[%s807_s1 + $0x8] sm:$0xf]  ;;  %v31_v23 = vpack.c.bf16 %v30_v12, %v29_v10 }
   0x6   :  { %v460_v19 = vor.u32 %v538_v17, %v457_v18  ;;  %v536_v21 = vld [vmem:[%s807_s1 + $0x14] sm:$0xf0]  ;;  %v534_v22 = vld [vmem:[%s807_s1 + $0xc] sm:$0xf]  ;;  %v441_v24 = vld [vmem:[%s807_s1 + $0x18] sm:$0xf0] }
   0x7   :  { %10 = vsyncpa [#allocation3], 0  ;;  %vm26_vm0 = vcmask 261120   ;;  %v440_v25 = vor.u32 %v536_v21, %v439_v20  ;;  %v444_v26 = vor.u32 %v534_v22, %v441_v24  ;;  %v548_v27 = vld [vmem:[%s809_s3 + $0x38] sm:$0xff]  ;;  %v547_v29 = vld [vmem:[%s809_s3 + $0x30] sm:$0xff]  ;;  %s605_s9 = smov [#allocation2]  }
   0x8   :  { %101 = vmatpush.bf16.msra.mxu2 %v432_v11  ;;  %v556_v28 = vld [vmem:[%s809_s3 + $0x78] sm:$0xff]  ;;  %366 = vmatpush.bf16.msra.mxu0 %v548_v27  ;;  %v555_v30 = vld [vmem:[%s809_s3 + $0x70] sm:$0xff]  ;;  %v546_v31 = vld [vmem:[%s809_s3 + $0x28] sm:$0xff]  ;;  %s415_s10 = sshll.u32 %s605_s9, 4  ;;  %s417_s13 = sshll.u32 %s811_s5, 4  ;;  %s416_s10 = int_to_ptr.vmem [resolvable:$true] %s415_s10  ;;  %s418_s13 = int_to_ptr.hbm [resolvable:$true] %s417_s13 }
   0x9   :  { %115 = vmatpush.bf16.msra.mxu3 %v436_v15  ;;  %380 = vmatpush.bf16.msra.mxu1 %v556_v28  ;;  %v554_v32 = vld [vmem:[%s809_s3 + $0x68] sm:$0xff]  ;;  %v717_v33 = vld [vmem:[%s808_s2] sm:$0xf]  ;;  %v544_v39 = vld [vmem:[%s809_s3 + $0x18] sm:$0xff]  ;;  %s607_s14 = smov 8  }
   0xa   :  { %v545_v34 = vld [vmem:[%s809_s3 + $0x20] sm:$0xff]  ;;  %v42_v36 = vperm.slane %v717_v33, 0  ;;  %v43_v37 = vperm.slane %v717_v33, 1  ;;  %v552_v40 = vld [vmem:[%s809_s3 + $0x58] sm:$0xff]  ;;  %v543_v46 = vld [vmem:[%s809_s3 + $0x10] sm:$0xff]  ;;  %v44_v21 = vperm.slane %v717_v33, 2 }
   0xb   :  { %461 = vmatmul.msk.bf16.vlgmr.msra.gmra.mxu2 %vm26_vm0, %v31_v23  ;;  %v553_v35 = vld [vmem:[%s809_s3 + $0x60] sm:$0xff]  ;;  %v551_v47 = vld [vmem:[%s809_s3 + $0x50] sm:$0xff]  ;;  %v542_v49 = vld [vmem:[%s809_s3 + $0x8] sm:$0xff] }
   0xc   :  { %128 = vmatpush.bf16.msrb.mxu2 %v456_v16  ;;  %462 = vmatmul.msk.bf16.vlgmr.msra.gmra.mxu3 %vm26_vm0, %v31_v23  ;;  %v550_v50 = vld [vmem:[%s809_s3 + $0x48] sm:$0xff]  ;;  %v541_v59 = vld [vmem:[%s809_s3] sm:$0xff] }
   0xd   :  { %142 = vmatpush.bf16.msrb.mxu3 %v460_v19  ;;  %367 = vmatpush.bf16.msra.mxu0 %v547_v29  ;;  %v549_v60 = vld [vmem:[%s809_s3 + $0x40] sm:$0xff] }
   0xe   :  { %381 = vmatpush.bf16.msra.mxu1 %v555_v30 }
  0x10   :  { %129 = vmatpush.bf16.msrb.mxu2 %v440_v25  ;;  %v45_v25 = vperm.slane %v717_v33, 3 }
  0x11   :  { %143 = vmatpush.bf16.msrb.mxu3 %v444_v26  ;;  %368 = vmatpush.bf16.msra.mxu0 %v546_v31 }
  0x12   :  { %382 = vmatpush.bf16.msra.mxu1 %v554_v32 }
  0x15   :  { %369 = vmatpush.bf16.msra.mxu0 %v545_v34 }
  0x16   :  { %383 = vmatpush.bf16.msra.mxu1 %v553_v35 }
  0x19   :  { %370 = vmatpush.bf16.msra.mxu0 %v544_v39 }
  0x1a   :  { %384 = vmatpush.bf16.msra.mxu1 %v552_v40 }
  0x1b   :  { %463 = vmatmul.msk.bf16.vlgmr.msrb.gmra.mxu2 %vm26_vm0, %v31_v23 }
  0x1c   :  { %464 = vmatmul.msk.bf16.vlgmr.msrb.gmra.mxu3 %vm26_vm0, %v31_v23 }
  0x1d   :  { %371 = vmatpush.bf16.msra.mxu0 %v543_v46 }
  0x1e   :  { %385 = vmatpush.bf16.msra.mxu1 %v551_v47 }
  0x21   :  { %372 = vmatpush.bf16.msra.mxu0 %v542_v49 }
  0x22   :  { %386 = vmatpush.bf16.msra.mxu1 %v550_v50 }
  0x25   :  { %373 = vmatpush.bf16.msra.mxu0 %v541_v59 }
  0x26   :  { %387 = vmatpush.bf16.msra.mxu1 %v549_v60 }
  0x8e   :  { %v103_v38 = vpop.f32.mrf.mxu2 }
  0x8f   :  { %v733_v41 = vadd.f32 %v103_v38, %v42_v36  ;;  %v117_v42 = vpop.f32.mrf.mxu3 }
  0x90   :  { %v735_v43 = vadd.f32 %v117_v42, %v43_v37 }
  0x91   :  { %v465_v44 = vmul.f32 -1.442695, %v733_v41 }
  0x92   :  { %v466_v45 = vmul.f32 -1.442695, %v735_v43 }
  0x93   :  { %562 = vpow2.f32 %v465_v44 }
  0x94   :  { %564 = vpow2.f32 %v466_v45 }
  0x96   :  { %v105_v48 = vpop.f32.mrf.mxu2 }
  0x97   :  { %v751_v51 = vadd.f32 %v105_v48, %v42_v36  ;;  %v119_v52 = vpop.f32.mrf.mxu3 }
  0x98   :  { %v753_v53 = vadd.f32 %v119_v52, %v43_v37 }
  0x99   :  { %v563_v54 = vpop.eup %562  ;;  %v467_v55 = vmul.f32 -1.442695, %v751_v51 }
  0x9a   :  { %v565_v56 = vpop.eup %564  ;;  %v162_v57 = vadd.f32 1.0, %v563_v54  ;;  %v468_v58 = vmul.f32 -1.442695, %v753_v53 }
  0x9b   :  { %v163_v61 = vadd.f32 1.0, %v565_v56  ;;  %566 = vpow2.f32 %v467_v55 }
  0x9c   :  { %568 = vrcp.f32 %v162_v57  ;;  %v175_v13 = vand.u32 2147483647, %v162_v57  ;;  %v177_v14 = vand.u32 2147483648, %v162_v57  ;;  %vm171_vm2 = vweird.f32 %v162_v57 }
  0x9d   :  { %570 = vrcp.f32 %v163_v61  ;;  %v190_v15 = vand.u32 2147483647, %v163_v61  ;;  %v192_v20 = vand.u32 2147483648, %v163_v61  ;;  %vm186_vm5 = vweird.f32 %v163_v61 }
  0x9e   :  { %572 = vpow2.f32 %v468_v58  ;;  %v131_v10 = vpop.f32.mrf.mxu2  ;;  %vm176_vm6 = vcmp.eq.f32.partialorder %v175_v13, 8.507059e+37  ;;  %v178_v26 = vor.u32 1.1754944e-38, %v177_v14 }
  0x9f   :  { %v145_v17 = vpop.f32.mrf.mxu3  ;;  %vm779_vm8 = vcmp.eq.f32.partialorder %v190_v15, 8.507059e+37  ;;  %v193_v35 = vor.u32 1.1754944e-38, %v192_v20  ;;  %v132_v39 = vadd.f32 %v131_v10, %v44_v21  ;;  %v561_v10 = vld [vmem:[%s810_s4] ss:$0 sm:$0xff]  ;;  %s606_s4 = smov 128  }
  0xa1   :  { %v567_v62 = vpop.eup %566 }
  0xa2   :  { %v569_v63 = vpop.eup %568  ;;  %v164_v0 = vadd.f32 1.0, %v567_v62 }
  0xa3   :  { %v571_v1 = vpop.eup %570  ;;  %v167_v2 = vmul.f32 %v569_v63, %v162_v57  ;;  %vm172_vm1 = vweird.f32 %v569_v63 }
  0xa4   :  { %v573_v3 = vpop.eup %572  ;;  %v182_v4 = vmul.f32 %v571_v1, %v163_v61  ;;  %574 = vrcp.f32 %v164_v0  ;;  %vm766_vm3 = vmor %vm171_vm2, %vm172_vm1  ;;  %vm187_vm4 = vweird.f32 %v571_v1  ;;  %v207_v27 = vand.u32 2147483648, %v164_v0 }
  0xa5   :  { %v168_v5 = vsub.f32 1.0, %v167_v2  ;;  %v763_v6 = vadd.f32 1.0, %v573_v3  ;;  %vm775_vm7 = vmor %vm186_vm5, %vm187_vm4  ;;  %v205_v32 = vand.u32 2147483647, %v164_v0  ;;  %vm201_vm10 = vweird.f32 %v164_v0 }
  0xa6   :  { %v183_v7 = vsub.f32 1.0, %v182_v4  ;;  %v208_v40 = vor.u32 1.1754944e-38, %v207_v27  ;;  %v133_v45 = vpop.f32.mrf.mxu2  ;;  %v604_v3 = vmov 0.0  }
  0xa7   :  { %v169_v8 = vmul.f32 %v569_v63, %v168_v5  ;;  %576 = vrcp.f32 %v763_v6  ;;  %v222_v38 = vand.u32 2147483648, %v763_v6  ;;  %v220_v44 = vand.u32 2147483647, %v763_v6  ;;  %v147_v56 = vpop.f32.mrf.mxu3  ;;  %27 = vst.msk [vmem:[#allocation2] sm:$0xff] %vm26_vm0, %v604_v3 }
  0xa8   :  { %v184_v9 = vmul.f32 %v571_v1, %v183_v7  ;;  %vm206_vm13 = vcmp.eq.f32.partialorder %v205_v32, 8.507059e+37  ;;  %vm216_vm14 = vweird.f32 %v763_v6  ;;  %v134_v55 = vadd.f32 %v133_v45, %v44_v21  ;;  %28 = vst.msk [vmem:[#allocation2 + $0x8] sm:$0xff] %vm26_vm0, %v604_v3 }
  0xa9   :  { %v170_v11 = vadd.f32 %v569_v63, %v169_v8  ;;  %v223_v54 = vor.u32 1.1754944e-38, %v222_v38  ;;  %vm221_vm1 = vcmp.eq.f32.partialorder %v220_v44, 8.507059e+37 }
  0xaa   :  { %v575_v12 = vpop.eup %574  ;;  %v185_v19 = vadd.f32 %v571_v1, %v184_v9 }
  0xab   :  { %v197_v16 = vmul.f32 %v575_v12, %v164_v0  ;;  %v174_v23 = vsel %vm766_vm3, %v569_v63, %v170_v11  ;;  %vm202_vm9 = vweird.f32 %v575_v12  ;;  %v148_v63 = vadd.f32 %v147_v56, %v45_v25 }
  0xac   :  { %v179_v34 = vsel %vm176_vm6, %v178_v26, %v174_v23  ;;  %v189_v33 = vsel %vm775_vm7, %v571_v1, %v185_v19  ;;  %vm203_vm11 = vmor %vm201_vm10, %vm202_vm9 }
  0xad   :  { %v577_v22 = vpop.eup %576  ;;  %v198_v24 = vsub.f32 1.0, %v197_v16  ;;  %v226_v46 = vmul.f32 %v179_v34, %v733_v41  ;;  %v194_v47 = vsel %vm779_vm8, %v193_v35, %v189_v33  ;;  %v146_v41 = vadd.f32 %v145_v17, %v45_v25 }
  0xae   :  { %v212_v28 = vmul.f32 %v577_v22, %v763_v6  ;;  %vm217_vm12 = vweird.f32 %v577_v22  ;;  %v227_v57 = vmul.f32 %v194_v47, %v735_v43  ;;  %v234_v4 = vld [vmem:[#allocation2] sm:$0xff] }
  0xaf   :  { %v199_v31 = vmul.f32 %v575_v12, %v198_v24  ;;  %vm218_vm15 = vmor %vm216_vm14, %vm217_vm12  ;;  %v230_v60 = vmul.f32 %v226_v46, %v132_v39  ;;  %v235_v8 = vld [vmem:[#allocation2 + $0x8] sm:$0xff] }
  0xb0   :  { %v213_v36 = vsub.f32 1.0, %v212_v28  ;;  %v231_v1 = vmul.f32 %v227_v57, %v146_v41 }
  0xb1   :  { %v200_v37 = vadd.f32 %v575_v12, %v199_v31 }
  0xb2   :  { %v214_v42 = vmul.f32 %v577_v22, %v213_v36 }
  0xb3   :  { %v204_v48 = vsel %vm203_vm11, %v575_v12, %v200_v37 }
  0xb4   :  { %v209_v49 = vsel %vm206_vm13, %v208_v40, %v204_v48  ;;  %v215_v50 = vadd.f32 %v577_v22, %v214_v42 }
  0xb5   :  { %v228_v52 = vmul.f32 %v209_v49, %v751_v51 }
  0xb6   :  { %v219_v58 = vsel %vm218_vm15, %v577_v22, %v215_v50 }
  0xb7   :  { %v224_v59 = vsel %vm221_vm1, %v223_v54, %v219_v58  ;;  %v232_v61 = vmul.f32 %v228_v52, %v134_v55 }
  0xb8   :  { %v229_v62 = vmul.f32 %v224_v59, %v753_v53 }
  0xb9   :  { %v236_v0 = vpack.c.bf16 %v232_v61, %v230_v60 }
  0xba   :  { %v233_v2 = vmul.f32 %v229_v62, %v148_v63 }
  0xbb   :  { %374 = vmatmul.bf16.vlgmr.msra.gmra.mxu0 %v236_v0 }
  0xbc   :  { %v237_v51 = vpack.c.bf16 %v233_v2, %v231_v1 }
  0xbe   :  { %388 = vmatmul.bf16.vlgmr.msra.gmra.mxu1 %v237_v51 }
 0x138   :  { %v375_v43 = vpop.f32.mrf.mxu0 }
 0x13b   :  { %v389_v5 = vpop.f32.mrf.mxu1 }
 0x13c   :  { %v390_v6 = vadd.f32 %v389_v5, %v375_v43 }
 0x13e   :  { %v394_v7 = vadd.f32 %v390_v6, %v234_v4 }
 0x140   :  { %396 = vst.msk [vmem:[#allocation2] sm:$0xff] %vm26_vm0, %v394_v7  ;;  %v377_v53 = vpop.f32.mrf.mxu0 }
 0x143   :  { %v391_v9 = vpop.f32.mrf.mxu1 }
 0x144   :  { %v392_v11 = vadd.f32 %v391_v9, %v377_v53 }
 0x146   :  { %v395_v12 = vadd.f32 %v392_v11, %v235_v8 }
 0x147   :  { %v401_v13 = vld [vmem:[#allocation2] sm:$0xff] }
 0x148   :  { %v407_v14 = vadd.f32 %v561_v10, %v401_v13  ;;  %397 = vst.msk [vmem:[#allocation2 + $0x8] sm:$0xff] %vm26_vm0, %v395_v12 }
 0x14a   :  { %409 = vst.msk [vmem:[#allocation2] sm:$0xff] %vm26_vm0, %v407_v14 }
 0x14f   :  { %v402_v15 = vld [vmem:[#allocation2 + $0x8] sm:$0xff] }
 0x150   :  { %v408_v16 = vadd.f32 %v561_v10, %v402_v15 }
 0x152   :  { %410 = vst.msk [vmem:[#allocation2 + $0x8] sm:$0xff] %vm26_vm0, %v408_v16 }
 0x153   :  { %423 = dma.vmem_to_hbm [thread:$0]  %s416_s10, 256, %s418_s13, [#allocation3], %s606_s4, %s606_s4, %s607_s14  }
 0x154   :  { %602 = dma.done.wait [#allocation3], 256  }
 0x155   :  { %603 = vsyncadd [#allocation3], 4294967040 }
 0x156   :  { %428 = vsyncpa [#allocation3], 1 }

</bundles_post_ra>
